<compile_context>
chip_gen: v7x
topology: tpu7x:2x2x1
jax: 0.10.0
libtpu: 0.0.40
codegen_flags: <defaults>
</compile_context>

<pallas_src>
import math
from functools import partial

import jax
import jax.numpy as jnp
from jax.experimental import pallas as pl
from jax.experimental.pallas import tpu as pltpu


# ----------------------------------------------------------------------------
# Pallas kernels
# ----------------------------------------------------------------------------
def _linear_kernel(x_ref, w_ref, b_ref, o_ref):
    # Single dot over the full K; weight block is resident across the M grid.
    acc = jnp.dot(x_ref[...], w_ref[...], preferred_element_type=jnp.float32)
    o_ref[...] = (acc + b_ref[...]).astype(o_ref.dtype)


def pallas_linear(x, w, b=None, *, tm=256):
    """x: (M, K) @ w: (K, N) [+ b] -> (M, N) float32.

    Weight/bias are VMEM-resident (one HBM read); activations stream in TM-row
    tiles; bf16 MXU inputs with f32 accumulation.
    """
    M, K = x.shape
    K2, N = w.shape
    assert K == K2
    bias = (jnp.zeros((N,), jnp.float32) if b is None else b)
    bias = bias.astype(jnp.float32).reshape(1, N)
    x_bf = x.astype(jnp.bfloat16)
    w_bf = w.astype(jnp.bfloat16)

    if M <= tm:
        Mp, tm_eff = M, M                    # single full-extent block, no padding
    else:
        Mp = -(-M // tm) * tm
        tm_eff = tm
        x_bf = jnp.pad(x_bf, ((0, Mp - M), (0, 0)))

    out = pl.pallas_call(
        _linear_kernel,
        out_shape=jax.ShapeDtypeStruct((Mp, N), jnp.float32),
        grid_spec=pltpu.PrefetchScalarGridSpec(
            num_scalar_prefetch=0,
            grid=(Mp // tm_eff,),
            in_specs=[
                pl.BlockSpec((tm_eff, K), lambda i: (i, 0)),   # stream activations
                pl.BlockSpec((K, N), lambda i: (0, 0)),        # resident weight
                pl.BlockSpec((1, N), lambda i: (0, 0)),        # resident bias
            ],
            out_specs=pl.BlockSpec((tm_eff, N), lambda i: (i, 0)),
        ),
        compiler_params=pltpu.CompilerParams(
            dimension_semantics=("parallel",),
            vmem_limit_bytes=32 * 1024 * 1024),
    )(x_bf, w_bf, bias)
    return out[:M]


def _attn_kernel(q_ref, k_ref, v_ref, o_ref, *, scale):
    q = q_ref[0]                                   # (H, N, Dh) bf16
    k = k_ref[0]                                   # (H, N, Dh) bf16
    v = v_ref[0]                                   # (H, N, Dh) bf16
    # Scores: contract last dims directly (no k.T / relayout), f32 accumulate.
    s = jnp.einsum('hqd,hkd->hqk', q, k,
                   preferred_element_type=jnp.float32) * scale
    s = s - jnp.max(s, axis=-1, keepdims=True)     # softmax in f32
    p = jnp.exp(s)
    p = p / jnp.sum(p, axis=-1, keepdims=True)
    ctx = jnp.einsum('hqk,hkd->hqd', p.astype(v.dtype), v,
                     preferred_element_type=jnp.float32)
    o_ref[0] = ctx.astype(o_ref.dtype)


def pallas_attention(q, k, v, scale):
    """q, k, v: (B, H, N, Dh) -> (B, H, N, Dh) float32.

    One grid step per batch element; all heads are batched into a single block
    (full-extent blocks => no (8,128) padding of the small N / head dims).
    """
    B, H, N, Dh = q.shape
    q = q.astype(jnp.bfloat16)
    k = k.astype(jnp.bfloat16)
    v = v.astype(jnp.bfloat16)
    out = pl.pallas_call(
        partial(_attn_kernel, scale=scale),
        out_shape=jax.ShapeDtypeStruct((B, H, N, Dh), jnp.float32),
        grid_spec=pltpu.PrefetchScalarGridSpec(
            num_scalar_prefetch=0,
            grid=(B,),
            in_specs=[
                pl.BlockSpec((1, H, N, Dh), lambda b: (b, 0, 0, 0)),
                pl.BlockSpec((1, H, N, Dh), lambda b: (b, 0, 0, 0)),
                pl.BlockSpec((1, H, N, Dh), lambda b: (b, 0, 0, 0)),
            ],
            out_specs=pl.BlockSpec((1, H, N, Dh), lambda b: (b, 0, 0, 0)),
        ),
        compiler_params=pltpu.CompilerParams(
            dimension_semantics=("parallel",),
            vmem_limit_bytes=32 * 1024 * 1024),
    )(q, k, v)
    return out


# ----------------------------------------------------------------------------
# Forward pass (matches PyTorch Attention.forward in eval mode)
# ----------------------------------------------------------------------------
def attention_forward(params, x, num_heads):
    B, N, C = x.shape
    Dh = C // num_heads
    scale = Dh ** (-0.5)

    # qkv = nn.Linear(dim, 3*dim, bias=False)
    qkv = pallas_linear(x.reshape(B * N, C), params['w_qkv'])        # (B*N, 3C)
    qkv = qkv.reshape(B, N, 3, num_heads, Dh).transpose(2, 0, 3, 1, 4)
    q, k, v = qkv[0], qkv[1], qkv[2]                                  # (B, H, N, Dh)

    ctx = pallas_attention(q, k, v, scale)                            # (B, H, N, Dh)
    ctx = ctx.transpose(0, 2, 1, 3).reshape(B * N, C)

    # proj = nn.Linear(dim, dim)   (attn_drop / proj_drop: identity in eval)
    out = pallas_linear(ctx, params['w_proj'], params['b_proj'])
    return out.reshape(B, N, C)


def attention_reference(params, x, num_heads):
    """Pure-JAX f32 reference for a sanity check."""
    B, N, C = x.shape
    Dh = C // num_heads
    scale = Dh ** (-0.5)
    qkv = x.reshape(B * N, C) @ params['w_qkv']
    qkv = qkv.reshape(B, N, 3, num_heads, Dh).transpose(2, 0, 3, 1, 4)
    q, k, v = qkv[0], qkv[1], qkv[2]
    s = jnp.einsum('bhqd,bhkd->bhqk', q, k) * scale
    p = jax.nn.softmax(s, axis=-1)
    ctx = jnp.einsum('bhqk,bhkd->bhqd', p, v)
    ctx = ctx.transpose(0, 2, 1, 3).reshape(B * N, C)
    return (ctx @ params['w_proj'] + params['b_proj']).reshape(B, N, C)


# ----------------------------------------------------------------------------
# Deterministic parameter init (PyTorch default nn.Linear init, qkv_bias=False)
# ----------------------------------------------------------------------------
def init_params(key, dim):
    k1, k2, k3 = jax.random.split(key, 3)
    bound_qkv = 1.0 / math.sqrt(dim)
    bound_proj = 1.0 / math.sqrt(dim)
    # Stored already transposed to (in, out) so kernels compute x @ W.
    w_qkv = jax.random.uniform(k1, (3 * dim, dim), jnp.float32,
                               -bound_qkv, bound_qkv).T
    w_proj = jax.random.uniform(k2, (dim, dim), jnp.float32,
                                -bound_proj, bound_proj).T
    b_proj = jax.random.uniform(k3, (dim,), jnp.float32,
                                -bound_proj, bound_proj)
    return {'w_qkv': w_qkv, 'w_proj': w_proj, 'b_proj': b_proj}


if __name__ == "__main__":
    key = jax.random.PRNGKey(0)
    kp, kx = jax.random.split(key)

    B, N, C, num_heads = 2, 16, 64, 8          # head_dim = 8

    params = init_params(kp, C)
    x = jax.random.normal(kx, (B, N, C), jnp.float32)

    fwd = jax.jit(partial(attention_forward, num_heads=num_heads))
    out = fwd(params, x)
    jax.block_until_ready(out)
    assert out.shape == (B, N, C), out.shape

    ref = attention_reference(params, x, num_heads)
    max_err = float(jnp.max(jnp.abs(out - ref)))
    # bf16 MXU inputs with f32 accumulation -> small tolerance.
    assert max_err < 5e-2, f"max abs err {max_err}"

    print("KERNEL_OK")
</pallas_src>

<mosaic_0001>
module attributes {stable_mosaic.version = 11 : i64} {
  func.func @_linear_kernel(%arg0: i32, %arg1: memref<32x64xbf16, #tpu.memory_space<vmem>>, %arg2: memref<64x192xbf16, #tpu.memory_space<vmem>>, %arg3: memref<1x192xf32, #tpu.memory_space<vmem>>, %arg4: memref<32x192xf32, #tpu.memory_space<vmem>>) attributes {dimension_semantics = [#tpu.dimension_semantics<parallel>], iteration_bounds = array<i64: 1>, scalar_prefetch = 0 : i64, scratch_operands = 0 : i64, tpu.core_type = #tpu.core_type<tc>, window_params = [{transform_indices = @transform_0, window_bounds = array<i64: 32, 64>}, {pipeline_mode = #tpu.pipeline_mode<synchronous>, transform_indices = @transform_1, window_bounds = array<i64: 64, 192>}, {pipeline_mode = #tpu.pipeline_mode<synchronous>, transform_indices = @transform_2, window_bounds = array<i64: 1, 192>}, {transform_indices = @transform_3, window_bounds = array<i64: 32, 192>}]} {
    %c0 = arith.constant 0 : index
    %c0_0 = arith.constant 0 : index
    %0 = vector.load %arg1[%c0, %c0_0] : memref<32x64xbf16, #tpu.memory_space<vmem>>, vector<32x64xbf16>
    %c0_1 = arith.constant 0 : index
    %c0_2 = arith.constant 0 : index
    %1 = vector.load %arg2[%c0_1, %c0_2] : memref<64x192xbf16, #tpu.memory_space<vmem>>, vector<64x192xbf16>
    %cst = arith.constant dense<0.000000e+00> : vector<32x192xf32>
    %2 = tpu.matmul %0, %1, %cst {dimension_numbers = #tpu.dot_dimension_numbers<[1], [0], [0], [1], [0, 0, 1, 1], [], []>} : vector<32x64xbf16>, vector<64x192xbf16>, vector<32x192xf32> -> vector<32x192xf32>
    %c0_3 = arith.constant 0 : index
    %c0_4 = arith.constant 0 : index
    %3 = vector.load %arg3[%c0_3, %c0_4] : memref<1x192xf32, #tpu.memory_space<vmem>>, vector<1x192xf32>
    %4 = vector.broadcast %3 : vector<1x192xf32> to vector<32x192xf32>
    %5 = arith.addf %2, %4 : vector<32x192xf32>
    %c0_5 = arith.constant 0 : index
    %c0_6 = arith.constant 0 : index
    %6 = vector.load %arg4[%c0_5, %c0_6] : memref<32x192xf32, #tpu.memory_space<vmem>>, vector<32x192xf32>
    tpu.vector_store %arg4[%c0_5, %c0_6], %5 {strides = array<i32>} : memref<32x192xf32, #tpu.memory_space<vmem>>, vector<32x192xf32>,
    return
  }
  func.func @transform_0(%arg0: i32) -> (i32, i32) {
    %c0_i32 = arith.constant 0 : i32
    %c0_i32_0 = arith.constant 0 : i32
    return %arg0, %c0_i32 : i32, i32
  }
  func.func @transform_1(%arg0: i32) -> (i32, i32) {
    %c0_i32 = arith.constant 0 : i32
    %c0_i32_0 = arith.constant 0 : i32
    %c0_i32_1 = arith.constant 0 : i32
    return %c0_i32, %c0_i32_0 : i32, i32
  }
  func.func @transform_2(%arg0: i32) -> (i32, i32) {
    %c0_i32 = arith.constant 0 : i32
    %c0_i32_0 = arith.constant 0 : i32
    %c0_i32_1 = arith.constant 0 : i32
    return %c0_i32, %c0_i32_0 : i32, i32
  }
  func.func @transform_3(%arg0: i32) -> (i32, i32) {
    %c0_i32 = arith.constant 0 : i32
    %c0_i32_0 = arith.constant 0 : i32
    return %arg0, %c0_i32 : i32, i32
  }
}

module attributes {stable_mosaic.version = 11 : i64} {
  func.func @_attn_kernel(%arg0: i32, %arg1: memref<1x8x16x8xbf16, #tpu.memory_space<vmem>>, %arg2: memref<1x8x16x8xbf16, #tpu.memory_space<vmem>>, %arg3: memref<1x8x16x8xbf16, #tpu.memory_space<vmem>>, %arg4: memref<1x8x16x8xf32, #tpu.memory_space<vmem>>) attributes {dimension_semantics = [#tpu.dimension_semantics<parallel>], iteration_bounds = array<i64: 2>, scalar_prefetch = 0 : i64, scratch_operands = 0 : i64, tpu.core_type = #tpu.core_type<tc>, window_params = [{transform_indices = @transform_0, window_bounds = array<i64: 1, 8, 16, 8>}, {transform_indices = @transform_1, window_bounds = array<i64: 1, 8, 16, 8>}, {transform_indices = @transform_2, window_bounds = array<i64: 1, 8, 16, 8>}, {transform_indices = @transform_3, window_bounds = array<i64: 1, 8, 16, 8>}]} {
    %c0 = arith.constant 0 : index
    %c0_0 = arith.constant 0 : index
    %c0_1 = arith.constant 0 : index
    %c0_2 = arith.constant 0 : index
    %0 = vector.load %arg1[%c0, %c0_0, %c0_1, %c0_2] : memref<1x8x16x8xbf16, #tpu.memory_space<vmem>>, vector<1x8x16x8xbf16>
    %1 = vector.shape_cast %0 : vector<1x8x16x8xbf16> to vector<8x16x8xbf16>
    %c0_3 = arith.constant 0 : index
    %c0_4 = arith.constant 0 : index
    %c0_5 = arith.constant 0 : index
    %c0_6 = arith.constant 0 : index
    %2 = vector.load %arg2[%c0_3, %c0_4, %c0_5, %c0_6] : memref<1x8x16x8xbf16, #tpu.memory_space<vmem>>, vector<1x8x16x8xbf16>
    %3 = vector.shape_cast %2 : vector<1x8x16x8xbf16> to vector<8x16x8xbf16>
    %c0_7 = arith.constant 0 : index
    %c0_8 = arith.constant 0 : index
    %c0_9 = arith.constant 0 : index
    %c0_10 = arith.constant 0 : index
    %4 = vector.load %arg3[%c0_7, %c0_8, %c0_9, %c0_10] : memref<1x8x16x8xbf16, #tpu.memory_space<vmem>>, vector<1x8x16x8xbf16>
    %5 = vector.shape_cast %4 : vector<1x8x16x8xbf16> to vector<8x16x8xbf16>
    "tpu.trace_start"() <{level = 10 : i32, message = "hqd,hkd->hqk"}> : () -> ()
    %cst = arith.constant dense<0.000000e+00> : vector<8x16x16xf32>
    %6 = tpu.matmul %1, %3, %cst {dimension_numbers = #tpu.dot_dimension_numbers<[2], [2], [1], [1], [0, 0, 0, 1, 1, 1], [0], [0]>} : vector<8x16x8xbf16>, vector<8x16x8xbf16>, vector<8x16x16xf32> -> vector<8x16x16xf32>
    "tpu.trace_stop"() : () -> ()
    %cst_11 = arith.constant 0.353553385 : f32
    %7 = vector.broadcast %cst_11 : f32 to vector<8x16x16xf32>
    %8 = arith.mulf %6, %7 : vector<8x16x16xf32>
    %cst_12 = arith.constant dense<0xFF800000> : vector<8x16xf32>
    %9 = vector.multi_reduction <maximumf>, %8, %cst_12 [2] : vector<8x16x16xf32> to vector<8x16xf32>
    %10 = vector.shape_cast %9 : vector<8x16xf32> to vector<8x16x1xf32>
    %11 = vector.broadcast %10 : vector<8x16x1xf32> to vector<8x16x16xf32>
    %12 = arith.subf %8, %11 : vector<8x16x16xf32>
    %13 = math.exp %12 : vector<8x16x16xf32>
    %cst_13 = arith.constant dense<0.000000e+00> : vector<8x16xf32>
    %14 = vector.multi_reduction <add>, %13, %cst_13 [2] : vector<8x16x16xf32> to vector<8x16xf32>
    %15 = vector.shape_cast %14 : vector<8x16xf32> to vector<8x16x1xf32>
    %16 = vector.broadcast %15 : vector<8x16x1xf32> to vector<8x16x16xf32>
    %17 = arith.divf %13, %16 : vector<8x16x16xf32>
    %18 = arith.truncf %17 : vector<8x16x16xf32> to vector<8x16x16xbf16>
    "tpu.trace_start"() <{level = 10 : i32, message = "hqk,hkd->hqd"}> : () -> ()
    %cst_14 = arith.constant dense<0.000000e+00> : vector<8x16x8xf32>
    %19 = tpu.matmul %18, %5, %cst_14 {dimension_numbers = #tpu.dot_dimension_numbers<[2], [1], [1], [2], [0, 0, 0, 1, 1, 2], [0], [0]>} : vector<8x16x16xbf16>, vector<8x16x8xbf16>, vector<8x16x8xf32> -> vector<8x16x8xf32>
    "tpu.trace_stop"() : () -> ()
    %c0_15 = arith.constant 0 : index
    %c0_16 = arith.constant 0 : index
    %c0_17 = arith.constant 0 : index
    %c0_18 = arith.constant 0 : index
    %20 = vector.load %arg4[%c0_15, %c0_16, %c0_17, %c0_18] : memref<1x8x16x8xf32, #tpu.memory_space<vmem>>, vector<1x8x16x8xf32>
    %21 = vector.shape_cast %20 : vector<1x8x16x8xf32> to vector<8x16x8xf32>
    %22 = vector.shape_cast %19 : vector<8x16x8xf32> to vector<1x8x16x8xf32>
    tpu.vector_store %arg4[%c0_15, %c0_16, %c0_17, %c0_18], %22 {strides = array<i32>} : memref<1x8x16x8xf32, #tpu.memory_space<vmem>>, vector<1x8x16x8xf32>,
    return
  }
  func.func @transform_0(%arg0: i32) -> (i32, i32, i32, i32) {
    %c0_i32 = arith.constant 0 : i32
    %c0_i32_0 = arith.constant 0 : i32
    %c0_i32_1 = arith.constant 0 : i32
    %c0_i32_2 = arith.constant 0 : i32
    return %arg0, %c0_i32, %c0_i32_0, %c0_i32_1 : i32, i32, i32, i32
  }
  func.func @transform_1(%arg0: i32) -> (i32, i32, i32, i32) {
    %c0_i32 = arith.constant 0 : i32
    %c0_i32_0 = arith.constant 0 : i32
    %c0_i32_1 = arith.constant 0 : i32
    %c0_i32_2 = arith.constant 0 : i32
    return %arg0, %c0_i32, %c0_i32_0, %c0_i32_1 : i32, i32, i32, i32
  }
  func.func @transform_2(%arg0: i32) -> (i32, i32, i32, i32) {
    %c0_i32 = arith.constant 0 : i32
    %c0_i32_0 = arith.constant 0 : i32
    %c0_i32_1 = arith.constant 0 : i32
    %c0_i32_2 = arith.constant 0 : i32
    return %arg0, %c0_i32, %c0_i32_0, %c0_i32_1 : i32, i32, i32, i32
  }
  func.func @transform_3(%arg0: i32) -> (i32, i32, i32, i32) {
    %c0_i32 = arith.constant 0 : i32
    %c0_i32_0 = arith.constant 0 : i32
    %c0_i32_1 = arith.constant 0 : i32
    %c0_i32_2 = arith.constant 0 : i32
    return %arg0, %c0_i32, %c0_i32_0, %c0_i32_1 : i32, i32, i32, i32
  }
}

module attributes {stable_mosaic.version = 11 : i64} {
  func.func @_linear_kernel(%arg0: i32, %arg1: memref<32x64xbf16, #tpu.memory_space<vmem>>, %arg2: memref<64x64xbf16, #tpu.memory_space<vmem>>, %arg3: memref<1x64xf32, #tpu.memory_space<vmem>>, %arg4: memref<32x64xf32, #tpu.memory_space<vmem>>) attributes {dimension_semantics = [#tpu.dimension_semantics<parallel>], iteration_bounds = array<i64: 1>, scalar_prefetch = 0 : i64, scratch_operands = 0 : i64, tpu.core_type = #tpu.core_type<tc>, window_params = [{transform_indices = @transform_0, window_bounds = array<i64: 32, 64>}, {pipeline_mode = #tpu.pipeline_mode<synchronous>, transform_indices = @transform_1, window_bounds = array<i64: 64, 64>}, {pipeline_mode = #tpu.pipeline_mode<synchronous>, transform_indices = @transform_2, window_bounds = array<i64: 1, 64>}, {transform_indices = @transform_3, window_bounds = array<i64: 32, 64>}]} {
    %c0 = arith.constant 0 : index
    %c0_0 = arith.constant 0 : index
    %0 = vector.load %arg1[%c0, %c0_0] : memref<32x64xbf16, #tpu.memory_space<vmem>>, vector<32x64xbf16>
    %c0_1 = arith.constant 0 : index
    %c0_2 = arith.constant 0 : index
    %1 = vector.load %arg2[%c0_1, %c0_2] : memref<64x64xbf16, #tpu.memory_space<vmem>>, vector<64x64xbf16>
    %cst = arith.constant dense<0.000000e+00> : vector<32x64xf32>
    %2 = tpu.matmul %0, %1, %cst {dimension_numbers = #tpu.dot_dimension_numbers<[1], [0], [0], [1], [0, 0, 1, 1], [], []>} : vector<32x64xbf16>, vector<64x64xbf16>, vector<32x64xf32> -> vector<32x64xf32>
    %c0_3 = arith.constant 0 : index
    %c0_4 = arith.constant 0 : index
    %3 = vector.load %arg3[%c0_3, %c0_4] : memref<1x64xf32, #tpu.memory_space<vmem>>, vector<1x64xf32>
    %4 = vector.broadcast %3 : vector<1x64xf32> to vector<32x64xf32>
    %5 = arith.addf %2, %4 : vector<32x64xf32>
    %c0_5 = arith.constant 0 : index
    %c0_6 = arith.constant 0 : index
    %6 = vector.load %arg4[%c0_5, %c0_6] : memref<32x64xf32, #tpu.memory_space<vmem>>, vector<32x64xf32>
    tpu.vector_store %arg4[%c0_5, %c0_6], %5 {strides = array<i32>} : memref<32x64xf32, #tpu.memory_space<vmem>>, vector<32x64xf32>,
    return
  }
  func.func @transform_0(%arg0: i32) -> (i32, i32) {
    %c0_i32 = arith.constant 0 : i32
    %c0_i32_0 = arith.constant 0 : i32
    return %arg0, %c0_i32 : i32, i32
  }
  func.func @transform_1(%arg0: i32) -> (i32, i32) {
    %c0_i32 = arith.constant 0 : i32
    %c0_i32_0 = arith.constant 0 : i32
    %c0_i32_1 = arith.constant 0 : i32
    return %c0_i32, %c0_i32_0 : i32, i32
  }
  func.func @transform_2(%arg0: i32) -> (i32, i32) {
    %c0_i32 = arith.constant 0 : i32
    %c0_i32_0 = arith.constant 0 : i32
    %c0_i32_1 = arith.constant 0 : i32
    return %c0_i32, %c0_i32_0 : i32, i32
  }
  func.func @transform_3(%arg0: i32) -> (i32, i32) {
    %c0_i32 = arith.constant 0 : i32
    %c0_i32_0 = arith.constant 0 : i32
    return %arg0, %c0_i32 : i32, i32
  }
}

</mosaic_0001>

<bundles_post_ra>
// kernel: attention_forward.3
= control target key start
LH: loop header
LB: loop body
LE: loop exit
PB: predicated region body
PF: predicated region fallthrough
CT: control target
= control target key end

     0   :  { %v196_v1 = vmov 0   ;;  %vm89_vm0 = vcmask 523264   ;;  %v29_v11 = vlaneseq  ;;  %s280_s1 = inlined_call_operand.vmem [shape: bf16[64,192], index: 1, kind: input, shape index: {}]   ;;  %s281_s0 = inlined_call_operand.vmem [shape: bf16[32,64], index: 0, kind: input, shape index: {}]   ;;  %s282_s2 = inlined_call_operand.vmem [shape: f32[1,192], index: 2, kind: input, shape index: {}]   ;;  %s283_s3 = inlined_call_operand.vmem [shape: f32[32,192], index: 3, kind: output, shape index: {}]  }
   0x1   :  { %v182_v0 = vld [vmem:[%s280_s1 + $0x4] ss:$8 sps:$4 sm:$0xff]   ;;  %128 = vmatprep.mubr.bf16.mxu0 %v196_v1  ;;  %138 = vmatprep.mubr.bf16.mxu1 %v196_v1  ;;  %v184_v2 = vld [vmem:[%s280_s1] ss:$8 sps:$4 sm:$0xff]   ;;  %v185_v3 = vld [vmem:[%s280_s1 + $0x14] ss:$8 sps:$4 sm:$0xff]  }
   0x2   :  { %96 = vmatprep.subr.bf16.mxu0 %v182_v0  ;;  %173 = vmatprep.subr.bf16.mxu1 %v182_v0  ;;  %v187_v4 = vld [vmem:[%s280_s1 + $0x10] ss:$8 sps:$4 sm:$0xff]   ;;  %v188_v5 = vld [vmem:[%s280_s1 + $0x24] ss:$8 sps:$4 sm:$0xff]   ;;  %v190_v6 = vld [vmem:[%s280_s1 + $0x20] ss:$8 sps:$4 sm:$0xff]  }
   0x3   :  { %97 = vmatpush1.bf16.msra.mxu0 %v184_v2  ;;  %177 = vmatpush1.bf16.msra.mxu1 %v184_v2  ;;  %v191_v7 = vld [vmem:[%s280_s1 + $0x34] ss:$8 sps:$4 sm:$0xff]   ;;  %v193_v8 = vld [vmem:[%s280_s1 + $0x30] ss:$8 sps:$4 sm:$0xff]   ;;  %v194_v9 = vld [vmem:[%s281_s0] sm:$0xff]   ;;  %v30_v12 = vshrl.u32 %v29_v11, 7 }
   0x4   :  { %98 = vmatprep.subr.bf16.mxu0 %v185_v3  ;;  %174 = vmatprep.subr.bf16.mxu1 %v185_v3  ;;  %v195_v10 = vld [vmem:[%s281_s0 + $0x8] sm:$0xff]   ;;  %v27_v14 = vld [vmem:[%s282_s2] sm:$0x3] }
   0x5   :  { %v31_v13 = vsub.s32 0, %v30_v12  ;;  %v35_v15 = vsub.s32 1, %v30_v12 }
   0x7   :  { %99 = vmatpush1.bf16.msra.mxu0 %v187_v4  ;;  %178 = vmatpush1.bf16.msra.mxu1 %v187_v4  ;;  %v32_v16 = vrot.slane %v27_v14, %v31_v13  ;;  %v36_v17 = vrot.slane %v27_v14, %v35_v15 }
   0x8   :  { %100 = vmatprep.subr.bf16.mxu0 %v188_v5  ;;  %175 = vmatprep.subr.bf16.mxu1 %v188_v5 }
   0xb   :  { %101 = vmatpush1.bf16.msra.mxu0 %v190_v6  ;;  %179 = vmatpush1.bf16.msra.mxu1 %v190_v6 }
   0xc   :  { %102 = vmatprep.subr.bf16.mxu0 %v191_v7  ;;  %176 = vmatprep.subr.bf16.mxu1 %v191_v7 }
   0xf   :  { %103 = vmatpush1.bf16.msra.mxu0 %v193_v8  ;;  %180 = vmatpush1.bf16.msra.mxu1 %v193_v8 }
  0x12   :  { %171 = vmatmul.mubr.msk.bf16.vlgmr.msra.gmra.mrb[0].mxu0 %vm89_vm0, %v194_v9  ;;  %172 = vmatmul.mubr.msk.bf16.vlgmr.msra.gmra.mrb[0].mxu1 %vm89_vm0, %v195_v10 }
  0xe5   :  { %v130_v18 = vpop.f32.mrb[0].mxu0  ;;  %v140_v19 = vpop.f32.mrb[0].mxu1 }
  0xe6   :  { %v131_v20 = vadd.f32 %v130_v18, %v32_v16  ;;  %v141_v21 = vadd.f32 %v140_v19, %v32_v16  ;;  %v132_v22 = vpop.f32.mrb[1].mxu0  ;;  %v142_v23 = vpop.f32.mrb[1].mxu1 }
  0xe7   :  { %v133_v24 = vadd.f32 %v132_v22, %v36_v17  ;;  %v143_v25 = vadd.f32 %v142_v23, %v36_v17  ;;  %v134_v26 = vpop.f32.mrb[2].mxu0  ;;  %v144_v27 = vpop.f32.mrb[2].mxu1 }
  0xe8   :  { %149 = vst [vmem:[%s283_s3] sm:$0xff] %v131_v20  ;;  %153 = vst [vmem:[%s283_s3 + $0x20] sm:$0xff] %v141_v21  ;;  %v135_v28 = vadd.f32 %v134_v26, %v32_v16  ;;  %v145_v29 = vadd.f32 %v144_v27, %v32_v16  ;;  %v136_v30 = vpop.f32.mrb[3].mxu0  ;;  %v146_v31 = vpop.f32.mrb[3].mxu1 }
  0xe9   :  { %150 = vst.msk [vmem:[%s283_s3 + $0x8] sm:$0xff] %vm89_vm0, %v133_v24  ;;  %154 = vst.msk [vmem:[%s283_s3 + $0x28] sm:$0xff] %vm89_vm0, %v143_v25  ;;  %v137_v32 = vadd.f32 %v136_v30, %v36_v17  ;;  %v147_v33 = vadd.f32 %v146_v31, %v36_v17 }
  0xea   :  { %151 = vst [vmem:[%s283_s3 + $0x10] sm:$0xff] %v135_v28  ;;  %155 = vst [vmem:[%s283_s3 + $0x30] sm:$0xff] %v145_v29 }
  0xeb   :  { %152 = vst.msk [vmem:[%s283_s3 + $0x18] sm:$0xff] %vm89_vm0, %v137_v32  ;;  %156 = vst.msk [vmem:[%s283_s3 + $0x38] sm:$0xff] %vm89_vm0, %v147_v33 }

// kernel: attention_forward.5
= control target key start
LH: loop header
LB: loop body
LE: loop exit
PB: predicated region body
PF: predicated region fallthrough
CT: control target
= control target key end

     0   :  { %vm69_vm0 = vcmask 523264   ;;  %s267_s0 = inlined_call_operand.vmem [shape: bf16[32,64], index: 0, kind: input, shape index: {}]   ;;  %s268_s1 = inlined_call_operand.vmem [shape: bf16[64,64], index: 1, kind: input, shape index: {}]   ;;  %s269_s2 = inlined_call_operand.vmem [shape: f32[1,64], index: 2, kind: input, shape index: {}]   ;;  %s270_s3 = inlined_call_operand.hbm [shape: f32[32,64], index: 3, kind: output, shape index: {}]  }
   0x1   :  { %v175_v0 = vld [vmem:[%s268_s1] sm:$0xff]   ;;  %v176_v1 = vld [vmem:[%s268_s1 + $0x8] sm:$0xff]   ;;  %v177_v2 = vld [vmem:[%s268_s1 + $0x10] sm:$0xff]  }
   0x2   :  { %160 = vmatprep.subr.bf16.mxu0 %v175_v0  ;;  %v179_v3 = vld [vmem:[%s267_s0] sm:$0xff]  }
   0x3   :  { %161 = vmatpush3.bf16.msra.mxu0 %v175_v0  ;;  %168 = vmatprep.mubr.msk.bf16.mxu0 %vm69_vm0, %v179_v3 }
   0x4   :  { %162 = vmatprep.subr.bf16.mxu0 %v176_v1 }
   0x5   :  { %8 = vsyncpa [#allocation3], 0  ;;  %v178_v4 = vld [vmem:[%s268_s1 + $0x18] sm:$0xff]   ;;  %v180_v5 = vld [vmem:[%s267_s0 + $0x8] sm:$0xff]   ;;  %s205_s26 = smov [#allocation2]  }
   0x6   :  { %v145_v6 = vld [vmem:[%s269_s2] ss:$0 sm:$0xff]  ;;  %s134_s27 = sshll.u32 %s205_s26, 4  ;;  %s135_s27 = int_to_ptr.vmem [resolvable:$true] %s134_s27 }
   0x7   :  { %163 = vmatpush3.bf16.msra.mxu0 %v176_v1  ;;  %s181_s0 = scalar_lea.vmem %s135_s27, 512  ;;  %p186_p1 = scmp.lt.s32.totalorder %s135_s27, %s135_s27 }
   0x8   :  { %164 = vmatprep.subr.bf16.mxu0 %v177_v2  ;;  %p182_p0 = scmp.ne.s32.totalorder %s135_s27, %s181_s0  ;;  %p187_p2 = scmp.lt.s32.totalorder %s181_s0, %s181_s0 }
   0xa   :  { %p188_p3 = por %p187_p2, %p186_p1 }
   0xb   :  { %165 = vmatpush3.bf16.msra.mxu0 %v177_v2 }
   0xc   :  { %166 = vmatprep.subr.bf16.mxu0 %v178_v4  ;;  %p189_p4 = pnand %p188_p3, %p182_p0 }
   0xf   :  { %167 = vmatpush3.bf16.msra.mxu0 %v178_v4 }
  0x12   :  { %169 = vmatmul.mubr.msk.bf16.vlgmr.msra.gmra.mrb[0].mxu0 %vm69_vm0, %v180_v5 }
  0xe5   :  { %v170_v7 = vpop.f32.mrb[0].mxu0 }
  0xe6   :  { %v119_v8 = vadd.f32 %v170_v7, %v145_v6  ;;  %v110_v9 = vpop.f32.mrb[1].mxu0 }
  0xe7   :  { %v111_v10 = vadd.f32 %v145_v6, %v110_v9  ;;  %v171_v11 = vpop.f32.mrb[2].mxu0 }
  0xe8   :  { %127 = vst.msk [vmem:[#allocation2 + $0x10] sm:$0xff] %vm69_vm0, %v119_v8  ;;  %v122_v12 = vadd.f32 %v171_v11, %v145_v6  ;;  %v113_v13 = vpop.f32.mrb[3].mxu0 }
  0xe9   :  { %125 = vst.msk [vmem:[#allocation2] sm:$0xff] %vm69_vm0, %v111_v10  ;;  %v114_v14 = vadd.f32 %v145_v6, %v113_v13 }
  0xea   :  { %128 = vst.msk [vmem:[#allocation2 + $0x18] sm:$0xff] %vm69_vm0, %v122_v12 }
  0xeb   :  { %126 = vst.msk [vmem:[#allocation2 + $0x8] sm:$0xff] %vm69_vm0, %v114_v14 }
  0xec   :  { %192 = shalt.err (!%p189_p4)
}
  0xed   :  { %s193_s28 = scalar_lea.hbm %s270_s3, 512 }
  0xee   :  { %p194_p5 = scmp.ne.s32.totalorder %s270_s3, %s193_s28  ;;  %p197_p6 = scmp.lt.u32.totalorder %s193_s28, %s270_s3 }
  0xf0   :  { %p199_p7 = pnand %p197_p6, %p194_p5 }
  0xf2   :  { %202 = shalt.err (!%p199_p7)
}
  0xf3   :  { %s206_s6 = smov 128   ;;  %s207_s7 = smov 8  }
  0xf4   :  { %140 = dma.vmem_to_hbm [thread:$0]  %s135_s27, 512, %s270_s3, [#allocation3], %s206_s6, %s206_s6, %s207_s7  }
  0xf5   :  { %203 = dma.done.wait [#allocation3], 512  }
  0xf6   :  { %204 = vsyncadd [#allocation3], 4294966784 }
  0xf7   :  { %144 = vsyncpa [#allocation3], 1 }

// kernel: attention_forward.4
= control target key start
LH: loop header
LB: loop body
LE: loop exit
PB: predicated region body
PF: predicated region fallthrough
CT: control target
= control target key end

     0   :  { %s1728_s12 = smov 0   ;;  %s2056_s0 = inlined_call_operand.vmem [shape: bf16[2,8,16,8], index: 0, kind: input, shape index: {}]   ;;  %s2057_s1 = inlined_call_operand.vmem [shape: bf16[2,8,16,8], index: 1, kind: input, shape index: {}]   ;;  %s2058_s2 = inlined_call_operand.vmem [shape: bf16[2,8,16,8], index: 2, kind: input, shape index: {}]   ;;  %s2059_s3 = inlined_call_operand.vmem [shape: f32[2,8,16,8], index: 3, kind: output, shape index: {}]  }
   0x1 LB: > { %s1413_s13 = sadd.s32 4294967295, %s1704_s12   ;;  %p1417_p0 = scmp.ge.s32.totalorder %s1704_s12, 1  ;;  %s1704_s12 = sphi %s1728_s12, %s13_s12  }
   0x2   : > { %p157_p1 = scmp.lt.s32.totalorder %s1704_s12, 3 }
   0x4   : > { %p158_p2 = pnand %p1417_p0, %p157_p1 }
   0x5   : > { %p191_p3 = scmp.lt.s32.totalorder (!%p158_p2), %s1413_s13, 1  ;;  %v1706_v0 = vmov (!%p158_p2), 0.0   ;;  %vm1707_vm0 = vmmov (!%p158_p2), 0   ;;  %vm270_vm1 = vcmask (!%p158_p2), 64512   ;;  %vm733_vm2 = vcmask (!%p158_p2), 130048  }
   0x6   : > { %161 = sbr.rel (%p158_p2) target bundleno = 802 (0x322), region = 32  ;;  %1504 = vmatprep.subr.bf16.mxu0 (!%p158_p2), %v1706_v0  ;;  %1510 = vmatprep.subr.bf16.mxu1 (!%p158_p2), %v1706_v0 }
   0x7   : > { %1506 = vmatprep.mubr.msk.bf16.mxu0 (!%p158_p2), %vm1707_vm0, %v1706_v0  ;;  %1512 = vmatprep.mubr.msk.bf16.mxu1 (!%p158_p2), %vm1707_vm0, %v1706_v0 }
   0xd   : > { %s2061_s13 = smov (!%p191_p3, %s1413_s13), 1 }
   0xe   : > { %s1745_s14 = sshll.u32 %s2061_s13, 6  ;;  %s1471_s24 = sshll.u32 %s2061_s13, 7 }
   0xf   : > { %s1751_s17 = scalar_lea.vmem %s2057_s1, %s1745_s14  ;;  %s1758_s20 = scalar_lea.vmem %s2056_s0, %s1745_s14 }
  0x10   : > { %v1610_v1 = vld [vmem:[%s1751_s17] sm:$0xff]   ;;  %v1611_v2 = vld [vmem:[%s1751_s17 + $0x8] sm:$0xff]   ;;  %v1614_v5 = vld [vmem:[%s1751_s17 + $0x10] sm:$0xff]   ;;  %s1787_s23 = scalar_lea.vmem %s2058_s2, %s1745_s14  ;;  %s2019_s27 = scalar_lea.vmem %s2059_s3, %s1471_s24 }
  0x11   : > { %v275_v3 = vsel %vm270_vm1, %v1610_v1, 0  ;;  %v332_v4 = vsel %vm270_vm1, %v1611_v2, 0  ;;  %v1615_v6 = vld [vmem:[%s1751_s17 + $0x18] sm:$0xff]   ;;  %v1612_v7 = vld [vmem:[%s1758_s20] sm:$0xff]   ;;  %v1613_v8 = vld [vmem:[%s1758_s20 + $0x8] sm:$0xff]   ;;  %v389_v9 = vsel %vm270_vm1, %v1614_v5, 0 }
  0x12   : > { %1505 = vmatpush3.bf16.xpose.msra.mxu0 %v275_v3  ;;  %1511 = vmatpush3.bf16.xpose.msra.mxu1 %v332_v4  ;;  %v446_v10 = vsel %vm270_vm1, %v1615_v6, 0  ;;  %v1617_v11 = vld [vmem:[%s1751_s17 + $0x20] sm:$0xff]   ;;  %v1619_v12 = vld [vmem:[%s1751_s17 + $0x28] sm:$0xff]   ;;  %v1616_v13 = vld [vmem:[%s1758_s20 + $0x10] sm:$0xff]  }
  0x13   : > { %1516 = vmatprep.subr.bf16.mxu0 %v1706_v0  ;;  %1522 = vmatprep.subr.bf16.mxu1 %v1706_v0  ;;  %v1618_v14 = vld [vmem:[%s1758_s20 + $0x18] sm:$0xff]   ;;  %v503_v15 = vsel %vm270_vm1, %v1617_v11, 0  ;;  %v560_v16 = vsel %vm270_vm1, %v1619_v12, 0  ;;  %v1621_v17 = vld [vmem:[%s1751_s17 + $0x30] sm:$0xff]   ;;  %v1620_v19 = vld [vmem:[%s1758_s20 + $0x20] sm:$0xff]  }
  0x14   : > { %v1623_v18 = vld [vmem:[%s1751_s17 + $0x38] sm:$0xff]   ;;  %v1622_v20 = vld [vmem:[%s1758_s20 + $0x28] sm:$0xff]   ;;  %v617_v21 = vsel %vm270_vm1, %v1621_v17, 0  ;;  %v1624_v23 = vld [vmem:[%s1758_s20 + $0x30] sm:$0xff]  }
  0x15   : > { %v674_v22 = vsel %vm270_vm1, %v1623_v18, 0  ;;  %v1625_v24 = vld [vmem:[%s1758_s20 + $0x38] sm:$0xff]  }
  0x19   : > { %1507 = vmatmul.mubr.msk.bf16.vlgmr.msra.gmra.mrb[0].mxu0 %vm270_vm1, %v1612_v7  ;;  %1513 = vmatmul.mubr.msk.bf16.vlgmr.msra.gmra.mrb[0].mxu1 %vm270_vm1, %v1613_v8 }
  0x1a   : > { %1517 = vmatpush3.bf16.xpose.msra.mxu0 %v389_v9  ;;  %1523 = vmatpush3.bf16.xpose.msra.mxu1 %v446_v10 }
  0x1b   : > { %1518 = vmatprep.mubr.msk.bf16.mxu0 %vm1707_vm0, %v1706_v0  ;;  %1528 = vmatprep.subr.bf16.mxu0 %v1706_v0 }
  0x1c   : > { %1524 = vmatprep.mubr.msk.bf16.mxu1 %vm1707_vm0, %v1706_v0  ;;  %1534 = vmatprep.subr.bf16.mxu1 %v1706_v0 }
  0x21   : > { %1519 = vmatmul.mubr.msk.bf16.vlgmr.msra.gmra.mrb[4].mxu0 %vm270_vm1, %v1616_v13  ;;  %1525 = vmatmul.mubr.msk.bf16.vlgmr.msra.gmra.mrb[4].mxu1 %vm270_vm1, %v1618_v14 }
  0x22   : > { %1529 = vmatpush3.bf16.xpose.msra.mxu0 %v503_v15  ;;  %1535 = vmatpush3.bf16.xpose.msra.mxu1 %v560_v16 }
  0x23   : > { %1530 = vmatprep.mubr.msk.bf16.mxu0 %vm1707_vm0, %v1706_v0  ;;  %1540 = vmatprep.subr.bf16.mxu0 %v1706_v0 }
  0x24   : > { %1536 = vmatprep.mubr.msk.bf16.mxu1 %vm1707_vm0, %v1706_v0  ;;  %1546 = vmatprep.subr.bf16.mxu1 %v1706_v0 }
  0x29   : > { %1531 = vmatmul.mubr.msk.bf16.vlgmr.msra.gmra.mrb[8].mxu0 %vm270_vm1, %v1620_v19  ;;  %1537 = vmatmul.mubr.msk.bf16.vlgmr.msra.gmra.mrb[8].mxu1 %vm270_vm1, %v1622_v20 }
  0x2a   : > { %1541 = vmatpush3.bf16.xpose.msra.mxu0 %v617_v21  ;;  %1547 = vmatpush3.bf16.xpose.msra.mxu1 %v674_v22 }
  0x2b   : > { %1542 = vmatprep.mubr.msk.bf16.mxu0 %vm1707_vm0, %v1706_v0  ;;  %1548 = vmatprep.mubr.msk.bf16.mxu1 %vm1707_vm0, %v1706_v0 }
  0x2c   : > { %1552 = vmatprep.subr.bf16.mxu0 %v1706_v0  ;;  %1558 = vmatprep.subr.bf16.mxu1 %v1706_v0 }
  0x31   : > { %1543 = vmatmul.mubr.msk.bf16.vlgmr.msra.gmra.mrb[12].mxu0 %vm270_vm1, %v1624_v23  ;;  %1549 = vmatmul.mubr.msk.bf16.vlgmr.msra.gmra.mrb[12].mxu1 %vm270_vm1, %v1625_v24 }
  0x32   : > { %1554 = vmatprep.mubr.msk.bf16.mxu0 %vm1707_vm0, %v1706_v0  ;;  %1560 = vmatprep.mubr.msk.bf16.mxu1 %vm1707_vm0, %v1706_v0 }
  0xec   : > { %v311_v25 = vpop.f32.mrb[0].mxu0  ;;  %v368_v27 = vpop.f32.mrb[0].mxu1 }
  0xed   : > { %v1821_v26 = vmul.f32 0.35355338, %v311_v25  ;;  %v1508_v28 = vpop.f32.mrb[1].mxu0  ;;  %v1823_v29 = vmul.f32 0.35355338, %v368_v27  ;;  %v1514_v31 = vpop.f32.mrb[1].mxu1 }
  0xee   : > { %v314_v30 = vpop.f32.mrb[2].mxu0  ;;  %v371_v34 = vpop.f32.mrb[2].mxu1 }
  0xef   : > { %v1825_v32 = vmul.f32 0.35355338, %v314_v30  ;;  %v1509_v33 = vpop.f32.mrb[3].mxu0  ;;  %v734_v35 = vsel %vm733_vm2, %v1821_v26, -inf  ;;  %v1829_v36 = vmul.f32 0.35355338, %v371_v34 }
  0xf0   : > { %v740_v37 = vsel %vm733_vm2, %v1823_v29, -inf  ;;  %v1515_v38 = vpop.f32.mrb[3].mxu1  ;;  %735 = vmax.xlane.f32.xlu0 %v734_v35 }
  0xf1   : > { %741 = vmax.xlane.f32.xlu1 %v740_v37  ;;  %v743_v39 = vsel %vm733_vm2, %v1829_v36, -inf  ;;  %v737_v40 = vsel %vm733_vm2, %v1825_v32, -inf }
  0xf4   : > { %738 = vmax.xlane.f32.xlu0 %v737_v40  ;;  %v425_v41 = vpop.f32.mrb[4].mxu0  ;;  %v482_v44 = vpop.f32.mrb[4].mxu1 }
  0xf5   : > { %744 = vmax.xlane.f32.xlu1 %v743_v39  ;;  %v1837_v42 = vmul.f32 0.35355338, %v425_v41  ;;  %v1520_v43 = vpop.f32.mrb[5].mxu0  ;;  %v1839_v46 = vmul.f32 0.35355338, %v482_v44  ;;  %v1526_v47 = vpop.f32.mrb[5].mxu1 }
  0xf6   : > { %v428_v45 = vpop.f32.mrb[6].mxu0  ;;  %v485_v51 = vpop.f32.mrb[6].mxu1 }
  0xf7   : > { %v1841_v48 = vmul.f32 0.35355338, %v428_v45  ;;  %v1521_v49 = vpop.f32.mrb[7].mxu0  ;;  %v746_v50 = vsel %vm733_vm2, %v1837_v42, -inf  ;;  %v1845_v52 = vmul.f32 0.35355338, %v485_v51 }
  0xf8   : > { %747 = vmax.xlane.f32.xlu0 %v746_v50  ;;  %v1527_v53 = vpop.f32.mrb[7].mxu1  ;;  %v752_v55 = vsel %vm733_vm2, %v1839_v46, -inf }
  0xf9   : > { %v749_v54 = vsel %vm733_vm2, %v1841_v48, -inf  ;;  %v755_v56 = vsel %vm733_vm2, %v1845_v52, -inf }
  0xfa   : > { %750 = vmax.xlane.f32.xlu1 %v749_v54 }
  0xfc   : > { %753 = vmax.xlane.f32.xlu0 %v752_v55  ;;  %v539_v57 = vpop.f32.mrb[8].mxu0  ;;  %v596_v60 = vpop.f32.mrb[8].mxu1 }
  0xfd   : > { %v1853_v58 = vmul.f32 0.35355338, %v539_v57  ;;  %v1532_v59 = vpop.f32.mrb[9].mxu0  ;;  %v1855_v62 = vmul.f32 0.35355338, %v596_v60  ;;  %v1538_v63 = vpop.f32.mrb[9].mxu1 }
  0xfe   : > { %756 = vmax.xlane.f32.xlu1 %v755_v56  ;;  %v542_v61 = vpop.f32.mrb[10].mxu0  ;;  %v599_v4 = vpop.f32.mrb[10].mxu1 }
  0xff   : > { %v1857_v1 = vmul.f32 0.35355338, %v542_v61  ;;  %v1533_v2 = vpop.f32.mrb[11].mxu0  ;;  %v758_v3 = vsel %vm733_vm2, %v1853_v58, -inf  ;;  %v1861_v5 = vmul.f32 0.35355338, %v599_v4 }
 0x100   : > { %759 = vmax.xlane.f32.xlu0 %v758_v3  ;;  %v1539_v6 = vpop.f32.mrb[11].mxu1  ;;  %v764_v8 = vsel %vm733_vm2, %v1855_v62, -inf }
 0x101   : > { %v761_v7 = vsel %vm733_vm2, %v1857_v1, -inf  ;;  %v767_v9 = vsel %vm733_vm2, %v1861_v5, -inf }
 0x102   : > { %762 = vmax.xlane.f32.xlu1 %v761_v7 }
 0x104   : > { %765 = vmax.xlane.f32.xlu0 %v764_v8  ;;  %v653_v10 = vpop.f32.mrb[12].mxu0  ;;  %v710_v13 = vpop.f32.mrb[12].mxu1 }
 0x105   : > { %v1869_v11 = vmul.f32 0.35355338, %v653_v10  ;;  %v1544_v12 = vpop.f32.mrb[13].mxu0  ;;  %v1871_v15 = vmul.f32 0.35355338, %v710_v13  ;;  %v1550_v16 = vpop.f32.mrb[13].mxu1 }
 0x106   : > { %768 = vmax.xlane.f32.xlu1 %v767_v9  ;;  %v656_v14 = vpop.f32.mrb[14].mxu0  ;;  %v713_v20 = vpop.f32.mrb[14].mxu1 }
 0x107   : > { %v1873_v17 = vmul.f32 0.35355338, %v656_v14  ;;  %v1545_v18 = vpop.f32.mrb[15].mxu0  ;;  %v770_v19 = vsel %vm733_vm2, %v1869_v11, -inf  ;;  %v1877_v21 = vmul.f32 0.35355338, %v713_v20 }
 0x108   : > { %771 = vmax.xlane.f32.xlu0 %v770_v19  ;;  %v1551_v22 = vpop.f32.mrb[15].mxu1  ;;  %v776_v24 = vsel %vm733_vm2, %v1871_v15, -inf }
 0x109   : > { %v773_v23 = vsel %vm733_vm2, %v1873_v17, -inf  ;;  %v779_v25 = vsel %vm733_vm2, %v1877_v21, -inf }
 0x10a   : > { %774 = vmax.xlane.f32.xlu1 %v773_v23 }
 0x10c   : > { %777 = vmax.xlane.f32.xlu0 %v776_v24 }
 0x10e   : > { %780 = vmax.xlane.f32.xlu1 %v779_v25 }
 0x17d   : > { %v736_v27 = vpop.xlane.xlu0 %735 }
 0x17e   : > { %v742_v28 = vpop.xlane.xlu1 %741  ;;  %v782_v30 = vsub.f32 %v1821_v26, %v736_v27 }
 0x17f   : > { %v784_v31 = vsub.f32 %v1823_v29, %v742_v28 }
 0x180   : > { %v798_v33 = vmul.f32 1.442695, %v782_v30 }
 0x181   : > { %v802_v34 = vmul.f32 1.442695, %v784_v31  ;;  %v739_v35 = vpop.xlane.xlu0 %738 }
 0x182   : > { %1634 = vpow2.f32 %v798_v33  ;;  %v745_v37 = vpop.xlane.xlu1 %744  ;;  %v783_v38 = vsub.f32 %v1825_v32, %v739_v35 }
 0x183   : > { %v785_v39 = vsub.f32 %v1829_v36, %v745_v37  ;;  %1636 = vpow2.f32 %v802_v34 }
 0x184   : > { %v800_v40 = vmul.f32 1.442695, %v783_v38 }
 0x185   : > { %v804_v41 = vmul.f32 1.442695, %v785_v39  ;;  %v748_v43 = vpop.xlane.xlu0 %747 }
 0x186   : > { %1638 = vpow2.f32 %v800_v40  ;;  %v786_v44 = vsub.f32 %v1837_v42, %v748_v43 }
 0x187   : > { %v751_v45 = vpop.xlane.xlu1 %750  ;;  %1640 = vpow2.f32 %v804_v41 }
 0x188   : > { %v806_v26 = vmul.f32 1.442695, %v786_v44  ;;  %v787_v29 = vsub.f32 %v1841_v48, %v751_v45 }
 0x189   : > { %v754_v47 = vpop.xlane.xlu0 %753 }
 0x18a   : > { %1642 = vpow2.f32 %v806_v26  ;;  %v808_v49 = vmul.f32 1.442695, %v787_v29  ;;  %v788_v50 = vsub.f32 %v1839_v46, %v754_v47  ;;  %v1626_v29 = vld [vmem:[%s1787_s23] sm:$0xff]  }
 0x18b   : > { %v757_v32 = vpop.xlane.xlu1 %756  ;;  %1553 = vmatpush3.bf16.msra.mxu0 %v1626_v29 }
 0x18c   : > { %v1892_v51 = vpop.eup %1634  ;;  %1644 = vpow2.f32 %v808_v49  ;;  %v810_v36 = vmul.f32 1.442695, %v788_v50  ;;  %v789_v53 = vsub.f32 %v1845_v52, %v757_v32  ;;  %1564 = vmatprep.subr.bf16.mxu0 %v1706_v0  ;;  %v1627_v49 = vld [vmem:[%s1787_s23 + $0x8] sm:$0xff]  }
 0x18d   : > { %v760_v54 = vpop.xlane.xlu0 %759  ;;  %v830_v42 = vsel %vm733_vm2, %v1892_v51, 0.0  ;;  %v1897_v55 = vpop.eup %1636  ;;  %1559 = vmatpush3.bf16.msra.mxu1 %v1627_v49 }
 0x18e   : > { %1646 = vpow2.f32 %v810_v36  ;;  %v812_v48 = vmul.f32 1.442695, %v789_v53  ;;  %v790_v56 = vsub.f32 %v1853_v58, %v760_v54  ;;  %831 = vadd.xlane.f32.xlu0 %v830_v42  ;;  %v836_v52 = vsel %vm733_vm2, %v1897_v55, 0.0  ;;  %1570 = vmatprep.subr.bf16.mxu1 %v1706_v0 }
 0x18f   : > { %v763_v57 = vpop.xlane.xlu1 %762 }
 0x190   : > { %v1900_v46 = vpop.eup %1638  ;;  %1648 = vpow2.f32 %v812_v48  ;;  %v814_v59 = vmul.f32 1.442695, %v790_v56  ;;  %v791_v60 = vsub.f32 %v1857_v1, %v763_v57 }
 0x191   : > { %v766_v61 = vpop.xlane.xlu0 %765  ;;  %v833_v63 = vsel %vm733_vm2, %v1900_v46, 0.0  ;;  %v1907_v2 = vpop.eup %1640 }
 0x192   : > { %1650 = vpow2.f32 %v814_v59  ;;  %v816_v3 = vmul.f32 1.442695, %v791_v60  ;;  %v792_v58 = vsub.f32 %v1855_v62, %v766_v61  ;;  %837 = vadd.xlane.f32.xlu0 %v836_v52  ;;  %834 = vadd.xlane.f32.xlu1 %v833_v63  ;;  %v839_v10 = vsel %vm733_vm2, %v1907_v2, 0.0 }
 0x193   : > { %v769_v4 = vpop.xlane.xlu1 %768 }
 0x194   : > { %v1910_v6 = vpop.eup %1642  ;;  %1652 = vpow2.f32 %v816_v3  ;;  %v818_v1 = vmul.f32 1.442695, %v792_v58  ;;  %v793_v7 = vsub.f32 %v1861_v5, %v769_v4  ;;  %v1628_v3 = vld [vmem:[%s1787_s23 + $0x10] sm:$0xff]  }
 0x195   : > { %v772_v8 = vpop.xlane.xlu0 %771  ;;  %v842_v9 = vsel %vm733_vm2, %v1910_v6, 0.0 }
 0x196   : > { %v1917_v12 = vpop.eup %1644  ;;  %1654 = vpow2.f32 %v818_v1  ;;  %v820_v62 = vmul.f32 1.442695, %v793_v7  ;;  %v794_v13 = vsub.f32 %v1869_v11, %v772_v8  ;;  %843 = vadd.xlane.f32.xlu0 %v842_v9  ;;  %840 = vadd.xlane.f32.xlu1 %v839_v10 }
 0x197   : > { %v775_v14 = vpop.xlane.xlu1 %774  ;;  %v845_v22 = vsel %vm733_vm2, %v1917_v12, 0.0 }
 0x198   : > { %v1920_v16 = vpop.eup %1646  ;;  %1656 = vpow2.f32 %v820_v62  ;;  %v822_v5 = vmul.f32 1.442695, %v794_v13  ;;  %v795_v18 = vsub.f32 %v1873_v17, %v775_v14 }
 0x199   : > { %v778_v19 = vpop.xlane.xlu0 %777  ;;  %v848_v20 = vsel %vm733_vm2, %v1920_v16, 0.0 }
 0x19a   : > { %v1927_v23 = vpop.eup %1648  ;;  %1658 = vpow2.f32 %v822_v5  ;;  %v824_v11 = vmul.f32 1.442695, %v795_v18  ;;  %v796_v24 = vsub.f32 %v1871_v15, %v778_v19  ;;  %849 = vadd.xlane.f32.xlu0 %v848_v20  ;;  %846 = vadd.xlane.f32.xlu1 %v845_v22  ;;  %v1630_v18 = vld [vmem:[%s1787_s23 + $0x20] sm:$0xff]  }
 0x19b   : > { %v781_v25 = vpop.xlane.xlu1 %780  ;;  %v851_v31 = vsel %vm733_vm2, %v1927_v23, 0.0 }
 0x19c   : > { %v1930_v27 = vpop.eup %1650  ;;  %1660 = vpow2.f32 %v824_v11  ;;  %v826_v17 = vmul.f32 1.442695, %v796_v24  ;;  %v797_v28 = vsub.f32 %v1877_v21, %v781_v25  ;;  %v1631_v25 = vld [vmem:[%s1787_s23 + $0x28] sm:$0xff]  }
 0x19d   : > { %v854_v30 = vsel %vm733_vm2, %v1930_v27, 0.0 }
 0x19e   : > { %v1937_v33 = vpop.eup %1652  ;;  %1662 = vpow2.f32 %v826_v17  ;;  %v828_v34 = vmul.f32 1.442695, %v797_v28  ;;  %855 = vadd.xlane.f32.xlu0 %v854_v30  ;;  %852 = vadd.xlane.f32.xlu1 %v851_v31 }
 0x19f   : > { %v857_v21 = vsel %vm733_vm2, %v1937_v33, 0.0 }
 0x1a0   : > { %v1939_v15 = vpop.eup %1654  ;;  %1664 = vpow2.f32 %v828_v34  ;;  %v1632_v34 = vld [vmem:[%s1787_s23 + $0x30] sm:$0xff]  }
 0x1a1   : > { %v860_v35 = vsel %vm733_vm2, %v1939_v15, 0.0 }
 0x1a2   : > { %v1945_v37 = vpop.eup %1656  ;;  %861 = vadd.xlane.f32.xlu0 %v860_v35  ;;  %858 = vadd.xlane.f32.xlu1 %v857_v21 }
 0x1a3   : > { %v863_v40 = vsel %vm733_vm2, %v1945_v37, 0.0 }
 0x1a4   : > { %v1947_v38 = vpop.eup %1658 }
 0x1a5   : > { %v866_v39 = vsel %vm733_vm2, %v1947_v38, 0.0 }
 0x1a6   : > { %v1953_v41 = vpop.eup %1660  ;;  %867 = vadd.xlane.f32.xlu0 %v866_v39  ;;  %864 = vadd.xlane.f32.xlu1 %v863_v40  ;;  %v1633_v40 = vld [vmem:[%s1787_s23 + $0x38] sm:$0xff]  }
 0x1a7   : > { %v869_v45 = vsel %vm733_vm2, %v1953_v41, 0.0 }
 0x1a8   : > { %v1955_v43 = vpop.eup %1662 }
 0x1a9   : > { %v872_v44 = vsel %vm733_vm2, %v1955_v43, 0.0 }
 0x1aa   : > { %v1961_v26 = vpop.eup %1664  ;;  %873 = vadd.xlane.f32.xlu0 %v872_v44  ;;  %870 = vadd.xlane.f32.xlu1 %v869_v45 }
 0x1ab   : > { %v875_v47 = vsel %vm733_vm2, %v1961_v26, 0.0 }
 0x1ae   : > { %876 = vadd.xlane.f32.xlu1 %v875_v47 }
 0x21b   : > { %v832_v50 = vpop.xlane.xlu0 %831 }
 0x21c   : > { %1666 = vrcp.f32 %v832_v50 }
 0x21f   : > { %v838_v32 = vpop.xlane.xlu0 %837  ;;  %v835_v36 = vpop.xlane.xlu1 %834 }
 0x220   : > { %1668 = vrcp.f32 %v835_v36 }
 0x221   : > { %1670 = vrcp.f32 %v838_v32 }
 0x223   : > { %v844_v53 = vpop.xlane.xlu0 %843  ;;  %v841_v54 = vpop.xlane.xlu1 %840 }
 0x224   : > { %1672 = vrcp.f32 %v841_v54 }
 0x225   : > { %1674 = vrcp.f32 %v844_v53 }
 0x226   : > { %v1667_v56 = vpop.eup %1666 }
 0x227   : > { %v850_v42 = vpop.xlane.xlu0 %849  ;;  %v847_v48 = vpop.xlane.xlu1 %846  ;;  %v879_v61 = vmul.f32 %v1667_v56, %v1892_v51  ;;  %v1629_v51 = vld [vmem:[%s1787_s23 + $0x18] sm:$0xff]  }
 0x228   : > { %1676 = vrcp.f32 %v847_v48 }
 0x229   : > { %1678 = vrcp.f32 %v850_v42 }
 0x22a   : > { %v1669_v57 = vpop.eup %1668 }
 0x22b   : > { %v856_v59 = vpop.xlane.xlu0 %855  ;;  %v853_v60 = vpop.xlane.xlu1 %852  ;;  %v881_v52 = vmul.f32 %v1669_v57, %v1900_v46 }
 0x22c   : > { %v1671_v63 = vpop.eup %1670  ;;  %1680 = vrcp.f32 %v853_v60 }
 0x22d   : > { %v910_v58 = vpack.c.bf16 %v881_v52, %v879_v61  ;;  %1682 = vrcp.f32 %v856_v59  ;;  %v883_v8 = vmul.f32 %v1671_v63, %v1897_v55 }
 0x22e   : > { %v1673_v4 = vpop.eup %1672 }
 0x22f   : > { %v862_v1 = vpop.xlane.xlu0 %861  ;;  %v859_v7 = vpop.xlane.xlu1 %858  ;;  %v885_v9 = vmul.f32 %v1673_v4, %v1907_v2  ;;  %1555 = vmatmul.mubr.msk.bf16.vlgmr.msra.gmra.mrb[16].mxu0 %vm733_vm2, %v910_v58 }
 0x230   : > { %v1675_v10 = vpop.eup %1674  ;;  %1684 = vrcp.f32 %v859_v7  ;;  %1565 = vmatpush3.bf16.msra.mxu0 %v1628_v3  ;;  %1566 = vmatprep.mubr.msk.bf16.mxu0 %vm1707_vm0, %v1706_v0 }
 0x231   : > { %v911_v46 = vpack.c.bf16 %v885_v9, %v883_v8  ;;  %1576 = vmatprep.subr.bf16.mxu0 %v1706_v0  ;;  %1686 = vrcp.f32 %v862_v1  ;;  %v887_v55 = vmul.f32 %v1675_v10, %v1910_v6 }
 0x232   : > { %v1677_v62 = vpop.eup %1676 }
 0x233   : > { %v868_v13 = vpop.xlane.xlu0 %867  ;;  %v865_v14 = vpop.xlane.xlu1 %864  ;;  %v889_v2 = vmul.f32 %v1677_v62, %v1917_v12  ;;  %1561 = vmatmul.mubr.msk.bf16.vlgmr.msra.gmra.mrb[16].mxu1 %vm733_vm2, %v911_v46 }
 0x234   : > { %v1679_v5 = vpop.eup %1678  ;;  %1571 = vmatpush3.bf16.msra.mxu1 %v1629_v51  ;;  %1688 = vrcp.f32 %v865_v14  ;;  %1572 = vmatprep.mubr.msk.bf16.mxu1 %vm1707_vm0, %v1706_v0 }
 0x235   : > { %v912_v19 = vpack.c.bf16 %v889_v2, %v887_v55  ;;  %1582 = vmatprep.subr.bf16.mxu1 %v1706_v0  ;;  %1690 = vrcp.f32 %v868_v13  ;;  %v891_v6 = vmul.f32 %v1679_v5, %v1920_v16 }
 0x236   : > { %v1681_v20 = vpop.eup %1680 }
 0x237   : > { %v874_v22 = vpop.xlane.xlu0 %873  ;;  %v871_v11 = vpop.xlane.xlu1 %870  ;;  %v893_v12 = vmul.f32 %v1681_v20, %v1927_v23  ;;  %1567 = vmatmul.mubr.msk.bf16.vlgmr.msra.gmra.mrb[20].mxu0 %vm733_vm2, %v912_v19 }
 0x238   : > { %v1683_v24 = vpop.eup %1682  ;;  %1692 = vrcp.f32 %v871_v11  ;;  %1577 = vmatpush3.bf16.msra.mxu0 %v1630_v18  ;;  %1578 = vmatprep.mubr.msk.bf16.mxu0 %vm1707_vm0, %v1706_v0 }
 0x239   : > { %1694 = vrcp.f32 %v874_v22  ;;  %v913_v17 = vpack.c.bf16 %v893_v12, %v891_v6  ;;  %1588 = vmatprep.subr.bf16.mxu0 %v1706_v0  ;;  %v895_v16 = vmul.f32 %v1683_v24, %v1930_v27 }
 0x23a   : > { %v1685_v28 = vpop.eup %1684 }
 0x23b   : > { %v877_v30 = vpop.xlane.xlu1 %876  ;;  %v897_v23 = vmul.f32 %v1685_v28, %v1937_v33  ;;  %1573 = vmatmul.mubr.msk.bf16.vlgmr.msra.gmra.mrb[20].mxu1 %vm733_vm2, %v913_v17  ;;  %v1687_v31 = vpop.eup %1686 }
 0x23c   : > { %1696 = vrcp.f32 %v877_v30  ;;  %1583 = vmatpush3.bf16.msra.mxu1 %v1631_v25  ;;  %1584 = vmatprep.mubr.msk.bf16.mxu1 %vm1707_vm0, %v1706_v0  ;;  %v899_v39 = vmul.f32 %v1687_v31, %v1939_v15 }
 0x23d   : > { %v914_v35 = vpack.c.bf16 %v897_v23, %v895_v16  ;;  %1594 = vmatprep.subr.bf16.mxu1 %v1706_v0 }
 0x23e   : > { %v1689_v21 = vpop.eup %1688 }
 0x23f   : > { %v901_v27 = vmul.f32 %v1689_v21, %v1945_v37  ;;  %1579 = vmatmul.mubr.msk.bf16.vlgmr.msra.gmra.mrb[24].mxu0 %vm733_vm2, %v914_v35  ;;  %v1691_v33 = vpop.eup %1690 }
 0x240   : > { %1589 = vmatpush3.bf16.msra.mxu0 %v1632_v34  ;;  %1590 = vmatprep.mubr.msk.bf16.mxu0 %vm1707_vm0, %v1706_v0  ;;  %v903_v47 = vmul.f32 %v1691_v33, %v1947_v38 }
 0x241   : > { %v915_v44 = vpack.c.bf16 %v901_v27, %v899_v39 }
 0x242   : > { %v1693_v45 = vpop.eup %1692 }
 0x243   : > { %v1695_v29 = vpop.eup %1694  ;;  %v905_v49 = vmul.f32 %v1693_v45, %v1953_v41  ;;  %1585 = vmatmul.mubr.msk.bf16.vlgmr.msra.gmra.mrb[24].mxu1 %vm733_vm2, %v915_v44 }
 0x244   : > { %1595 = vmatpush3.bf16.msra.mxu1 %v1633_v40  ;;  %1596 = vmatprep.mubr.msk.bf16.mxu1 %vm1707_vm0, %v1706_v0  ;;  %v907_v50 = vmul.f32 %v1695_v29, %v1955_v43 }
 0x245   : > { %v916_v37 = vpack.c.bf16 %v905_v49, %v903_v47 }
 0x246   : > { %v1697_v15 = vpop.eup %1696 }
 0x247   : > { %v909_v32 = vmul.f32 %v1697_v15, %v1961_v26  ;;  %1591 = vmatmul.mubr.msk.bf16.vlgmr.msra.gmra.mrb[28].mxu0 %vm733_vm2, %v916_v37 }
 0x249   : > { %v917_v36 = vpack.c.bf16 %v909_v32, %v907_v50 }
 0x24b   : > { %1597 = vmatmul.mubr.msk.bf16.vlgmr.msra.gmra.mrb[28].mxu1 %vm733_vm2, %v917_v36 }
 0x302   : > { %v961_v0 = vpop.f32.mrb[16].mxu0 }
 0x303   : > { %1318 = vst.msk [vmem:[%s2019_s27] sm:$0xff] %vm270_vm1, %v961_v0  ;;  %v1556_v38 = vpop.f32.mrb[17].mxu0 }
 0x304   : > { %v964_v41 = vpop.f32.mrb[18].mxu0 }
 0x305   : > { %1319 = vst.msk [vmem:[%s2019_s27 + $0x8] sm:$0xff] %vm270_vm1, %v964_v41  ;;  %v1557_v43 = vpop.f32.mrb[19].mxu0 }
 0x306   : > { %v1011_v26 = vpop.f32.mrb[16].mxu1 }
 0x307   : > { %1320 = vst.msk [vmem:[%s2019_s27 + $0x10] sm:$0xff] %vm270_vm1, %v1011_v26  ;;  %v1562_v53 = vpop.f32.mrb[17].mxu1 }
 0x308   : > { %v1014_v54 = vpop.f32.mrb[18].mxu1 }
 0x309   : > { %1321 = vst.msk [vmem:[%s2019_s27 + $0x18] sm:$0xff] %vm270_vm1, %v1014_v54  ;;  %v1563_v42 = vpop.f32.mrb[19].mxu1 }
 0x30a   : > { %v1061_v48 = vpop.f32.mrb[20].mxu0 }
 0x30b   : > { %1322 = vst.msk [vmem:[%s2019_s27 + $0x20] sm:$0xff] %vm270_vm1, %v1061_v48  ;;  %v1568_v56 = vpop.f32.mrb[21].mxu0 }
 0x30c   : > { %v1064_v57 = vpop.f32.mrb[22].mxu0 }
 0x30d   : > { %1323 = vst.msk [vmem:[%s2019_s27 + $0x28] sm:$0xff] %vm270_vm1, %v1064_v57  ;;  %v1569_v59 = vpop.f32.mrb[23].mxu0 }
 0x30e   : > { %v1111_v60 = vpop.f32.mrb[20].mxu1 }
 0x30f   : > { %1324 = vst.msk [vmem:[%s2019_s27 + $0x30] sm:$0xff] %vm270_vm1, %v1111_v60  ;;  %v1574_v61 = vpop.f32.mrb[21].mxu1 }
 0x310   : > { %v1114_v52 = vpop.f32.mrb[22].mxu1 }
 0x311   : > { %1325 = vst.msk [vmem:[%s2019_s27 + $0x38] sm:$0xff] %vm270_vm1, %v1114_v52  ;;  %v1575_v63 = vpop.f32.mrb[23].mxu1 }
 0x312   : > { %v1161_v3 = vpop.f32.mrb[24].mxu0 }
 0x313   : > { %1326 = vst.msk [vmem:[%s2019_s27 + $0x40] sm:$0xff] %vm270_vm1, %v1161_v3  ;;  %v1580_v58 = vpop.f32.mrb[25].mxu0 }
 0x314   : > { %v1164_v4 = vpop.f32.mrb[26].mxu0 }
 0x315   : > { %1327 = vst.msk [vmem:[%s2019_s27 + $0x48] sm:$0xff] %vm270_vm1, %v1164_v4  ;;  %v1581_v1 = vpop.f32.mrb[27].mxu0 }
 0x316   : > { %v1211_v7 = vpop.f32.mrb[24].mxu1 }
 0x317   : > { %1328 = vst.msk [vmem:[%s2019_s27 + $0x50] sm:$0xff] %vm270_vm1, %v1211_v7  ;;  %v1586_v8 = vpop.f32.mrb[25].mxu1 }
 0x318   : > { %v1214_v9 = vpop.f32.mrb[26].mxu1 }
 0x319   : > { %1329 = vst.msk [vmem:[%s2019_s27 + $0x58] sm:$0xff] %vm270_vm1, %v1214_v9  ;;  %v1587_v10 = vpop.f32.mrb[27].mxu1 }
 0x31a   : > { %v1261_v51 = vpop.f32.mrb[28].mxu0 }
 0x31b   : > { %1330 = vst.msk [vmem:[%s2019_s27 + $0x60] sm:$0xff] %vm270_vm1, %v1261_v51  ;;  %v1592_v46 = vpop.f32.mrb[29].mxu0 }
 0x31c   : > { %v1264_v62 = vpop.f32.mrb[30].mxu0 }
 0x31d   : > { %1331 = vst.msk [vmem:[%s2019_s27 + $0x68] sm:$0xff] %vm270_vm1, %v1264_v62  ;;  %v1593_v13 = vpop.f32.mrb[31].mxu0 }
 0x31e   : > { %v1311_v14 = vpop.f32.mrb[28].mxu1 }
 0x31f   : > { %1332 = vst.msk [vmem:[%s2019_s27 + $0x70] sm:$0xff] %vm270_vm1, %v1311_v14  ;;  %v1598_v55 = vpop.f32.mrb[29].mxu1 }
 0x320   : > { %v1314_v2 = vpop.f32.mrb[30].mxu1 }
 0x321   : > { %1333 = vst.msk [vmem:[%s2019_s27 + $0x78] sm:$0xff] %vm270_vm1, %v1314_v2  ;;  %v1599_v5 = vpop.f32.mrb[31].mxu1 }
 0x322 PF: > { %s13_s12 = sadd.s32 1, %s1704_s12  }
 0x323   : > { %p10_p4 = scmp.ge.s32.totalorder %s13_s12, 4  }
 0x325   :  { %12 = sbr.rel (!%p10_p4) target bundleno = 1 (0x1), region = 68 }

</bundles_post_ra>
